<compile_context>
chip_gen: v7x
topology: tpu7x:2x2x1
jax: 0.10.0
libtpu: 0.0.40
codegen_flags: <defaults>
</compile_context>

<pallas_src>
import jax
import jax.numpy as jnp
from jax.experimental import pallas as pl
from jax.experimental.pallas import tpu as pltpu


# ---------------------------------------------------------------------------
# Pallas kernel: fused gather+linear, two GCN layers, global mean pool.
# ---------------------------------------------------------------------------
def gcn_cond_kernel(idx_ref, bidx_ref, tw1_ref, a_ref, b1_ref, w2_ref, b2_ref,
                    o_ref):
    n_pad = idx_ref.shape[0]
    c_pad = tw1_ref.shape[0]
    b_pad = o_ref.shape[0]

    # --- fused chord gather + layer-1 linear: onehot(node_idx) @ (T @ W1) ---
    chord_iota = jax.lax.broadcasted_iota(jnp.int32, (n_pad, c_pad), 1)
    sel = (chord_iota == idx_ref[...]).astype(jnp.bfloat16)          # (N_pad, C_pad)
    h = jnp.dot(sel, tw1_ref[...], preferred_element_type=jnp.float32)

    # --- layer 1 aggregation: relu(A @ (X @ W1) + b1), bias/ReLU in f32 ---
    h = jnp.dot(a_ref[...], h.astype(jnp.bfloat16),
                preferred_element_type=jnp.float32)
    h = jnp.maximum(h + b1_ref[...], 0.0).astype(jnp.bfloat16)       # (N_pad, H_pad)

    # --- layer 2: relu(A @ (H1 @ W2) + b2), kept in f32 afterwards ---
    h2 = jnp.dot(h, w2_ref[...], preferred_element_type=jnp.float32)
    h2 = jnp.dot(a_ref[...], h2.astype(jnp.bfloat16),
                 preferred_element_type=jnp.float32)
    h2 = jnp.maximum(h2 + b2_ref[...], 0.0)                          # f32 (N_pad, O_pad)

    # --- fused global_mean_pool (f32 throughout; B_pad x N x O is tiny) ---
    graph_iota = jax.lax.broadcasted_iota(jnp.int32, (b_pad, n_pad), 0)
    member = (graph_iota == bidx_ref[...]).astype(jnp.float32)        # (B_pad, N_pad)
    counts = jnp.maximum(jnp.sum(member, axis=1, keepdims=True), 1.0)
    pooled = jnp.dot(member, h2, preferred_element_type=jnp.float32)
    o_ref[...] = pooled / counts


# ---------------------------------------------------------------------------
# Helpers
# ---------------------------------------------------------------------------
def _round_up(x, m):
    return (x + m - 1) // m * m


def _vmem_budget_bytes(n_pad, c_pad, h_pad, o_pad, b_pad):
    """Rough VMEM residency (inputs + output + kernel temporaries), with 2x headroom.
    Clamped to [32 MiB default, 64 MiB v7x physical cap]."""
    io = (n_pad * 4 + n_pad * 4                      # idx, bidx
          + c_pad * h_pad * 2                        # TW1 bf16
          + n_pad * n_pad * 2                        # A bf16
          + h_pad * 4 + o_pad * 4                    # biases f32
          + h_pad * o_pad * 2                        # W2 bf16
          + b_pad * o_pad * 4)                       # output f32
    tmp = (n_pad * c_pad * 2                         # one-hot sel bf16
           + n_pad * h_pad * (4 + 2)                 # h f32 + bf16 copy
           + n_pad * o_pad * (4 + 2)                 # h2 f32 + bf16 copy
           + b_pad * n_pad * 4)                      # member f32
    budget = 2 * (io + tmp)
    return int(min(max(budget, 32 * 1024 * 1024), 64 * 1024 * 1024))


# ---------------------------------------------------------------------------
# One-time parameter preparation: padding, bf16 casts, and the T @ W1 fold.
# Done ONCE at "module init", NOT per forward call.
# ---------------------------------------------------------------------------
def make_gcn_params(chord_table, w1, b1, w2, b2):
    num_chords, feat_dim = chord_table.shape
    hidden_dim = w1.shape[1]
    out_dim = w2.shape[1]

    c_pad = _round_up(num_chords, 128)
    h_pad = _round_up(hidden_dim, 128)
    o_pad = _round_up(out_dim, 128)

    # Fold the chord-feature gather with the layer-1 input transform (tiny CxFxH matmul, f32).
    tw1 = chord_table.astype(jnp.float32) @ w1.astype(jnp.float32)   # (C, H)
    tw1p = jnp.pad(tw1, ((0, c_pad - num_chords),
                         (0, h_pad - hidden_dim))).astype(jnp.bfloat16)

    b1p = jnp.pad(b1.reshape(1, -1).astype(jnp.float32),
                  ((0, 0), (0, h_pad - hidden_dim)))
    w2p = jnp.pad(w2.astype(jnp.float32),
                  ((0, h_pad - hidden_dim), (0, o_pad - out_dim))).astype(jnp.bfloat16)
    b2p = jnp.pad(b2.reshape(1, -1).astype(jnp.float32),
                  ((0, 0), (0, o_pad - out_dim)))

    params = {"tw1": tw1p, "b1": b1p, "w2": w2p, "b2": b2p}
    return jax.device_put(params), out_dim


# ---------------------------------------------------------------------------
# Plain-JAX glue: PyG GCNConv gcn_norm scattered DIRECTLY into the padded
# (N_pad, N_pad) buffer (no extra N^2 pad copy). Edge-list scatter has no
# clean rectangular-DMA Pallas equivalent; it is jitted with the pallas_call.
# ---------------------------------------------------------------------------
def build_gcn_adjacency_padded(edge_index, edge_weight, num_nodes, n_pad):
    src = edge_index[0]
    tgt = edge_index[1]
    loop = jnp.arange(num_nodes, dtype=src.dtype)
    src = jnp.concatenate([src, loop])
    tgt = jnp.concatenate([tgt, loop])
    w = jnp.concatenate([edge_weight.astype(jnp.float32),
                         jnp.ones((num_nodes,), jnp.float32)])

    deg = jnp.zeros((num_nodes,), jnp.float32).at[tgt].add(w)
    dinv = jnp.where(deg > 0, jax.lax.rsqrt(deg), 0.0)
    norm = dinv[src] * w * dinv[tgt]

    a = jnp.zeros((n_pad, n_pad), jnp.float32).at[tgt, src].add(norm)
    return a.astype(jnp.bfloat16)                                    # pad rows/cols stay 0


def graph_conditioning_forward(params, node_indices, batch_index,
                               edge_index, edge_attr, *, batch_size, out_dim):
    """Returns (batch_size, out_dim) f32 condition vectors."""
    tw1p, b1p, w2p, b2p = params["tw1"], params["b1"], params["w2"], params["b2"]
    num_nodes = node_indices.shape[0]
    c_pad, h_pad = tw1p.shape
    o_pad = w2p.shape[1]

    n_pad = _round_up(num_nodes, 128)
    b_pad = _round_up(batch_size, 8)

    a_hat = build_gcn_adjacency_padded(edge_index, edge_attr, num_nodes, n_pad)

    idx = jnp.pad(node_indices.astype(jnp.int32),
                  (0, n_pad - num_nodes)).reshape(n_pad, 1)          # pad rows -> chord 0 (harmless)
    bidx = jnp.pad(batch_index.astype(jnp.int32),
                   (0, n_pad - num_nodes),
                   constant_values=-1).reshape(1, n_pad)             # pad nodes belong to no graph

    out_padded = pl.pallas_call(
        gcn_cond_kernel,
        out_shape=jax.ShapeDtypeStruct((b_pad, o_pad), jnp.float32),
        in_specs=[pl.BlockSpec(memory_space=pltpu.MemorySpace.VMEM)] * 7,
        out_specs=pl.BlockSpec(memory_space=pltpu.MemorySpace.VMEM),
        compiler_params=pltpu.CompilerParams(
            vmem_limit_bytes=_vmem_budget_bytes(n_pad, c_pad, h_pad, o_pad, b_pad)),
    )(idx, bidx, tw1p, a_hat, b1p, w2p, b2p)

    return out_padded[:batch_size, :out_dim]


# Single-dispatch forward: glue (adjacency scatter, index padding) + pallas_call under one jit.
graph_conditioning_forward_jit = jax.jit(graph_conditioning_forward,
                                         static_argnames=("batch_size", "out_dim"))


if __name__ == "__main__":
    key = jax.random.PRNGKey(0)
    k_feat, k_idx, k_w, k_w1, k_b1, k_w2, k_b2 = jax.random.split(key, 7)

    # Module configuration (small, consistent with the forward pass).
    num_chords = 24      # rows of chord_node_features
    feat_dim = 12        # chord feature dimension
    hidden_dim = 32
    out_dim = 16
    batch_size = 2
    nodes_per_graph = 8
    num_nodes = batch_size * nodes_per_graph

    # Deterministic "chord_node_features" lookup table.
    chord_node_features = jax.random.normal(k_feat, (num_chords, feat_dim), jnp.float32)

    # Deterministic GCN parameters (Linear has no bias; bias added after aggregation).
    w1 = 0.1 * jax.random.normal(k_w1, (feat_dim, hidden_dim), jnp.float32)
    b1 = 0.1 * jax.random.normal(k_b1, (1, hidden_dim), jnp.float32)
    w2 = 0.1 * jax.random.normal(k_w2, (hidden_dim, out_dim), jnp.float32)
    b2 = 0.1 * jax.random.normal(k_b2, (1, out_dim), jnp.float32)

    # One-time parameter prep (padding, casts, T@W1 fold) -- outside the per-call path.
    params, out_dim = make_gcn_params(chord_node_features, w1, b1, w2, b2)

    # Synthetic batched graph (PyG Batch equivalents).
    node_indices = jax.random.randint(k_idx, (num_nodes,), 0, num_chords)
    batch_index = jnp.repeat(jnp.arange(batch_size), nodes_per_graph)

    # Ring edges within each graph, both directions, with positive edge weights.
    src_list, tgt_list = [], []
    for g in range(batch_size):
        off = g * nodes_per_graph
        for i in range(nodes_per_graph):
            j = (i + 1) % nodes_per_graph
            src_list += [off + i, off + j]
            tgt_list += [off + j, off + i]
    edge_index = jnp.array([src_list, tgt_list], dtype=jnp.int32)
    edge_attr = 0.5 + jax.random.uniform(k_w, (edge_index.shape[1],), jnp.float32)

    out = graph_conditioning_forward_jit(
        params, node_indices, batch_index, edge_index, edge_attr,
        batch_size=batch_size, out_dim=out_dim)
    out = jax.block_until_ready(out)

    assert out.shape == (batch_size, out_dim)
    assert jnp.all(jnp.isfinite(out))
    print("KERNEL_OK")
</pallas_src>

<mosaic_0001>
module attributes {stable_mosaic.version = 11 : i64} {
  func.func private @main(%arg0: i32) attributes {dimension_semantics = [#tpu.dimension_semantics<core_parallel>], iteration_bounds = array<i64: 2>, tpu.core_type = #tpu.core_type<sc_scalar_subcore>, window_params = []} {
    return
  }
}

module attributes {stable_mosaic.version = 11 : i64} {
  func.func private @main(%arg0: i32) attributes {dimension_semantics = [#tpu.dimension_semantics<core_parallel>], iteration_bounds = array<i64: 2>, tpu.core_type = #tpu.core_type<sc_scalar_subcore>, window_params = []} {
    return
  }
}

module attributes {stable_mosaic.version = 11 : i64} {
  func.func @gcn_cond_kernel(%arg0: memref<128x1xi32, #tpu.memory_space<vmem>>, %arg1: memref<1x128xi32, #tpu.memory_space<vmem>>, %arg2: memref<128x128xbf16, #tpu.memory_space<vmem>>, %arg3: memref<128x128xbf16, #tpu.memory_space<vmem>>, %arg4: memref<1x128xf32, #tpu.memory_space<vmem>>, %arg5: memref<128x128xbf16, #tpu.memory_space<vmem>>, %arg6: memref<1x128xf32, #tpu.memory_space<vmem>>, %arg7: memref<8x128xf32, #tpu.memory_space<vmem>>) attributes {dimension_semantics = [], scalar_prefetch = 0 : i64, scratch_operands = 0 : i64, tpu.core_type = #tpu.core_type<tc>} {
    %0 = tpu.iota {dimensions = array<i32: 1>} : vector<128x128xi32>
    %c0 = arith.constant 0 : index
    %c0_0 = arith.constant 0 : index
    %1 = vector.load %arg0[%c0, %c0_0] : memref<128x1xi32, #tpu.memory_space<vmem>>, vector<128x1xi32>
    %2 = vector.broadcast %1 : vector<128x1xi32> to vector<128x128xi32>
    %3 = arith.cmpi eq, %0, %2 : vector<128x128xi32>
    %4 = arith.extui %3 : vector<128x128xi1> to vector<128x128xi32>
    %5 = arith.sitofp %4 : vector<128x128xi32> to vector<128x128xf32>
    %6 = arith.truncf %5 : vector<128x128xf32> to vector<128x128xbf16>
    %c0_1 = arith.constant 0 : index
    %c0_2 = arith.constant 0 : index
    %7 = vector.load %arg2[%c0_1, %c0_2] : memref<128x128xbf16, #tpu.memory_space<vmem>>, vector<128x128xbf16>
    %cst = arith.constant dense<0.000000e+00> : vector<128x128xf32>
    %8 = tpu.matmul %6, %7, %cst {dimension_numbers = #tpu.dot_dimension_numbers<[1], [0], [0], [1], [0, 0, 1, 1], [], []>} : vector<128x128xbf16>, vector<128x128xbf16>, vector<128x128xf32> -> vector<128x128xf32>
    %c0_3 = arith.constant 0 : index
    %c0_4 = arith.constant 0 : index
    %9 = vector.load %arg3[%c0_3, %c0_4] : memref<128x128xbf16, #tpu.memory_space<vmem>>, vector<128x128xbf16>
    %10 = arith.truncf %8 : vector<128x128xf32> to vector<128x128xbf16>
    %cst_5 = arith.constant dense<0.000000e+00> : vector<128x128xf32>
    %11 = tpu.matmul %9, %10, %cst_5 {dimension_numbers = #tpu.dot_dimension_numbers<[1], [0], [0], [1], [0, 0, 1, 1], [], []>} : vector<128x128xbf16>, vector<128x128xbf16>, vector<128x128xf32> -> vector<128x128xf32>
    %c0_6 = arith.constant 0 : index
    %c0_7 = arith.constant 0 : index
    %12 = vector.load %arg4[%c0_6, %c0_7] : memref<1x128xf32, #tpu.memory_space<vmem>>, vector<1x128xf32>
    %13 = vector.broadcast %12 : vector<1x128xf32> to vector<128x128xf32>
    %14 = arith.addf %11, %13 : vector<128x128xf32>
    %cst_8 = arith.constant 0.000000e+00 : f32
    %15 = vector.broadcast %cst_8 : f32 to vector<128x128xf32>
    %16 = arith.maximumf %14, %15 : vector<128x128xf32>
    %17 = arith.truncf %16 : vector<128x128xf32> to vector<128x128xbf16>
    %c0_9 = arith.constant 0 : index
    %c0_10 = arith.constant 0 : index
    %18 = vector.load %arg5[%c0_9, %c0_10] : memref<128x128xbf16, #tpu.memory_space<vmem>>, vector<128x128xbf16>
    %cst_11 = arith.constant dense<0.000000e+00> : vector<128x128xf32>
    %19 = tpu.matmul %17, %18, %cst_11 {dimension_numbers = #tpu.dot_dimension_numbers<[1], [0], [0], [1], [0, 0, 1, 1], [], []>} : vector<128x128xbf16>, vector<128x128xbf16>, vector<128x128xf32> -> vector<128x128xf32>
    %c0_12 = arith.constant 0 : index
    %c0_13 = arith.constant 0 : index
    %20 = vector.load %arg3[%c0_12, %c0_13] : memref<128x128xbf16, #tpu.memory_space<vmem>>, vector<128x128xbf16>
    %21 = arith.truncf %19 : vector<128x128xf32> to vector<128x128xbf16>
    %cst_14 = arith.constant dense<0.000000e+00> : vector<128x128xf32>
    %22 = tpu.matmul %20, %21, %cst_14 {dimension_numbers = #tpu.dot_dimension_numbers<[1], [0], [0], [1], [0, 0, 1, 1], [], []>} : vector<128x128xbf16>, vector<128x128xbf16>, vector<128x128xf32> -> vector<128x128xf32>
    %c0_15 = arith.constant 0 : index
    %c0_16 = arith.constant 0 : index
    %23 = vector.load %arg6[%c0_15, %c0_16] : memref<1x128xf32, #tpu.memory_space<vmem>>, vector<1x128xf32>
    %24 = vector.broadcast %23 : vector<1x128xf32> to vector<128x128xf32>
    %25 = arith.addf %22, %24 : vector<128x128xf32>
    %cst_17 = arith.constant 0.000000e+00 : f32
    %26 = vector.broadcast %cst_17 : f32 to vector<128x128xf32>
    %27 = arith.maximumf %25, %26 : vector<128x128xf32>
    %28 = tpu.iota {dimensions = array<i32: 0>} : vector<8x128xi32>
    %c0_18 = arith.constant 0 : index
    %c0_19 = arith.constant 0 : index
    %29 = vector.load %arg1[%c0_18, %c0_19] : memref<1x128xi32, #tpu.memory_space<vmem>>, vector<1x128xi32>
    %30 = vector.broadcast %29 : vector<1x128xi32> to vector<8x128xi32>
    %31 = arith.cmpi eq, %28, %30 : vector<8x128xi32>
    %32 = arith.extui %31 : vector<8x128xi1> to vector<8x128xi32>
    %33 = arith.sitofp %32 : vector<8x128xi32> to vector<8x128xf32>
    %cst_20 = arith.constant dense<0.000000e+00> : vector<8xf32>
    %34 = vector.multi_reduction <add>, %33, %cst_20 [1] : vector<8x128xf32> to vector<8xf32>
    %35 = vector.shape_cast %34 : vector<8xf32> to vector<8x1xf32>
    %cst_21 = arith.constant 1.000000e+00 : f32
    %36 = vector.broadcast %cst_21 : f32 to vector<8x1xf32>
    %37 = arith.maximumf %35, %36 : vector<8x1xf32>
    %cst_22 = arith.constant dense<0.000000e+00> : vector<8x128xf32>
    %38 = tpu.matmul %33, %27, %cst_22 {dimension_numbers = #tpu.dot_dimension_numbers<[1], [0], [0], [1], [0, 0, 1, 1], [], []>} : vector<8x128xf32>, vector<128x128xf32>, vector<8x128xf32> -> vector<8x128xf32>
    %39 = vector.broadcast %37 : vector<8x1xf32> to vector<8x128xf32>
    %40 = arith.divf %38, %39 : vector<8x128xf32>
    %c0_23 = arith.constant 0 : index
    %c0_24 = arith.constant 0 : index
    %41 = vector.load %arg7[%c0_23, %c0_24] : memref<8x128xf32, #tpu.memory_space<vmem>>, vector<8x128xf32>
    tpu.vector_store %arg7[%c0_23, %c0_24], %40 {strides = array<i32>} : memref<8x128xf32, #tpu.memory_space<vmem>>, vector<8x128xf32>,
    return
  }
}

</mosaic_0001>

<bundles_post_ra>
// kernel: graph_conditioning_forward.1
= control target key start
LH: loop header
LB: loop body
LE: loop exit
PB: predicated region body
PF: predicated region fallthrough
CT: control target
= control target key end

     0   :  { %v1252_v0 = vmov 0   ;;  %v27_v25 = vlaneseq  ;;  %v1253_v31 = vmov 1.0|1.0   ;;  %s1484_s0 = inlined_call_operand.vmem [shape: s32[128,1], index: 0, kind: input, shape index: {}]   ;;  %s1485_s2 = inlined_call_operand.vmem [shape: bf16[128,128], index: 2, kind: input, shape index: {}]   ;;  %s1486_s3 = inlined_call_operand.vmem [shape: bf16[128,128], index: 3, kind: input, shape index: {}]   ;;  %s1487_s5 = inlined_call_operand.vmem [shape: bf16[128,128], index: 5, kind: input, shape index: {}]   ;;  %s1488_s4 = inlined_call_operand.vmem [shape: f32[1,128], index: 4, kind: input, shape index: {}]   ;;  %s1489_s1 = inlined_call_operand.vmem [shape: s32[1,128], index: 1, kind: input, shape index: {}]   ;;  %s1490_s6 = inlined_call_operand.vmem [shape: f32[1,128], index: 6, kind: input, shape index: {}]   ;;  %s1491_s7 = inlined_call_operand.vmem [shape: f32[8,128], index: 7, kind: output, shape index: {}]  }
   0x1   :  { %1225 = vset.pattern.permute.xlu1 %v1252_v0  ;;  %1224 = vset.pattern.permute.xlu0 %v1252_v0  ;;  %v31_v1 = vld [vmem:[%s1484_s0 + $0x10] sm:$0xff]  ;;  %v29_v2 = vld [vmem:[%s1484_s0] sm:$0xff]  ;;  %v32_v3 = vld [vmem:[%s1484_s0 + $0x18] sm:$0xff] }
   0x2   :  { %52 = vperm.xlu1 %1225, %v31_v1   ;;  %46 = vperm.xlu0 %1224, %v29_v2   ;;  %v30_v4 = vld [vmem:[%s1484_s0 + $0x8] sm:$0xff]  ;;  %v33_v6 = vld [vmem:[%s1484_s0 + $0x20] sm:$0xff]  ;;  %v36_v9 = vld [vmem:[%s1484_s0 + $0x38] sm:$0xff]  ;;  %v28_v28 = vand.u32 127, %v27_v25 }
   0x3   :  { %v34_v5 = vld [vmem:[%s1484_s0 + $0x28] sm:$0xff]  ;;  %v1226_v7 = vld [vmem:[%s1485_s2] sm:$0xff]   ;;  %v35_v10 = vld [vmem:[%s1484_s0 + $0x30] sm:$0xff] }
   0x4   :  { %v1227_v8 = vld [vmem:[%s1485_s2 + $0x8] sm:$0xff]   ;;  %1031 = vmatprep.subr.bf16.mxu0 %v1226_v7  ;;  %v1228_v11 = vld [vmem:[%s1485_s2 + $0x10] sm:$0xff]   ;;  %v37_v13 = vld [vmem:[%s1484_s0 + $0x40] sm:$0xff] }
   0x5   :  { %1032 = vmatpush3.bf16.msra.mxu0 %v1226_v7  ;;  %v38_v12 = vld [vmem:[%s1484_s0 + $0x48] sm:$0xff]  ;;  %v1229_v14 = vld [vmem:[%s1485_s2 + $0x18] sm:$0xff]   ;;  %v39_v16 = vld [vmem:[%s1484_s0 + $0x50] sm:$0xff] }
   0x6   :  { %55 = vperm.xlu1 %1225, %v32_v3   ;;  %49 = vperm.xlu0 %1224, %v30_v4   ;;  %v40_v15 = vld [vmem:[%s1484_s0 + $0x58] sm:$0xff]  ;;  %v1230_v17 = vld [vmem:[%s1485_s2 + $0x20] sm:$0xff]   ;;  %v42_v18 = vld [vmem:[%s1484_s0 + $0x68] sm:$0xff] }
   0x7   :  { %1033 = vmatprep.subr.bf16.mxu0 %v1227_v8  ;;  %v41_v19 = vld [vmem:[%s1484_s0 + $0x60] sm:$0xff]  ;;  %v1231_v20 = vld [vmem:[%s1485_s2 + $0x28] sm:$0xff]   ;;  %v44_v21 = vld [vmem:[%s1484_s0 + $0x78] sm:$0xff] }
   0x8   :  { %v43_v22 = vld [vmem:[%s1484_s0 + $0x70] sm:$0xff]  ;;  %v1233_v24 = vld [vmem:[%s1485_s2 + $0x38] sm:$0xff]   ;;  %v1374_v44 = vld [vmem:[%s1486_s3] sm:$0xff]  }
   0x9   :  { %1034 = vmatpush3.bf16.msra.mxu0 %v1227_v8  ;;  %v1232_v23 = vld [vmem:[%s1485_s2 + $0x30] sm:$0xff]   ;;  %1079 = vmatprep.mubr.bf16.mxu1 %v1374_v44  ;;  %v1242_v45 = vld [vmem:[%s1487_s5] sm:$0xff]   ;;  %v1243_v46 = vld [vmem:[%s1487_s5 + $0x8] sm:$0xff]  }
   0xa   :  { %61 = vperm.xlu1 %1225, %v34_v5   ;;  %58 = vperm.xlu0 %1224, %v33_v6   ;;  %v1244_v47 = vld [vmem:[%s1487_s5 + $0x10] sm:$0xff]   ;;  %v1245_v48 = vld [vmem:[%s1487_s5 + $0x18] sm:$0xff]   ;;  %v1246_v49 = vld [vmem:[%s1487_s5 + $0x20] sm:$0xff]  }
   0xb   :  { %1035 = vmatprep.subr.bf16.mxu0 %v1228_v11  ;;  %v1247_v50 = vld [vmem:[%s1487_s5 + $0x28] sm:$0xff]  }
   0xd   :  { %1036 = vmatpush3.bf16.msra.mxu0 %v1228_v11  ;;  %v1398_v11 = vld [vmem:[%s1486_s3 + $0x8] sm:$0xff]  }
   0xe   :  { %67 = vperm.xlu1 %1225, %v36_v9   ;;  %64 = vperm.xlu0 %1224, %v35_v10  }
   0xf   :  { %1037 = vmatprep.subr.bf16.mxu0 %v1229_v14 }
  0x11   :  { %1038 = vmatpush3.bf16.msra.mxu0 %v1229_v14  ;;  %v1415_v14 = vld [vmem:[%s1486_s3 + $0x20] sm:$0xff]  }
  0x12   :  { %73 = vperm.xlu1 %1225, %v38_v12   ;;  %70 = vperm.xlu0 %1224, %v37_v13   ;;  %v1403_v12 = vld [vmem:[%s1486_s3 + $0x10] sm:$0xff]   ;;  %v1410_v13 = vld [vmem:[%s1486_s3 + $0x18] sm:$0xff]  }
  0x13   :  { %1039 = vmatprep.subr.bf16.mxu0 %v1230_v17 }
  0x15   :  { %1040 = vmatpush3.bf16.msra.mxu0 %v1230_v17  ;;  %v1434_v17 = vld [vmem:[%s1486_s3 + $0x38] sm:$0xff]  }
  0x16   :  { %79 = vperm.xlu1 %1225, %v40_v15   ;;  %76 = vperm.xlu0 %1224, %v39_v16   ;;  %v1422_v15 = vld [vmem:[%s1486_s3 + $0x28] sm:$0xff]   ;;  %v1427_v16 = vld [vmem:[%s1486_s3 + $0x30] sm:$0xff]  }
  0x17   :  { %1041 = vmatprep.subr.bf16.mxu0 %v1231_v20 }
  0x19   :  { %1042 = vmatpush3.bf16.msra.mxu0 %v1231_v20  ;;  %v929_v20 = vld [vmem:[%s1488_s4] ss:$0 sm:$0xff] }
  0x1a   :  { %85 = vperm.xlu1 %1225, %v42_v18   ;;  %82 = vperm.xlu0 %1224, %v41_v19   ;;  %v1248_v18 = vld [vmem:[%s1487_s5 + $0x30] sm:$0xff]   ;;  %v1249_v19 = vld [vmem:[%s1487_s5 + $0x38] sm:$0xff]  }
  0x1b   :  { %1043 = vmatprep.subr.bf16.mxu0 %v1232_v23 }
  0x1d   :  { %1044 = vmatpush3.bf16.msra.mxu0 %v1232_v23 }
  0x1e   :  { %91 = vperm.xlu1 %1225, %v44_v21   ;;  %88 = vperm.xlu0 %1224, %v43_v22  }
  0x1f   :  { %1045 = vmatprep.subr.bf16.mxu0 %v1233_v24 }
  0x21   :  { %1046 = vmatpush3.bf16.msra.mxu0 %v1233_v24 }
  0x22   :  { %1095 = vmatprep.subr.bf16.mxu0 %v1242_v45 }
  0x81   :  { %v53_v26 = vpop.permute.xlu1 %52  ;;  %v47_v27 = vpop.permute.xlu0 %46 }
  0x82   :  { %vm95_vm0 = vcmp.eq.s32.totalorder %v28_v28, %v53_v26  ;;  %vm93_vm3 = vcmp.eq.s32.totalorder %v28_v28, %v47_v27 }
  0x85   :  { %v56_v29 = vpop.permute.xlu1 %55  ;;  %v50_v30 = vpop.permute.xlu0 %49 }
  0x86   :  { %vm96_vm1 = vcmp.eq.s32.totalorder %v28_v28, %v56_v29  ;;  %vm94_vm2 = vcmp.eq.s32.totalorder %v28_v28, %v50_v30 }
  0x87   :  { %vm915_vm4 = vmpackc.low %vm96_vm1, %vm95_vm0 }
  0x88   :  { %vm913_vm5 = vmpackc.low %vm94_vm2, %vm93_vm3 }
  0x89   :  { %1047 = vmatprep.mubr.msk.bf16.mxu0 %vm913_vm5, %v1253_v31  ;;  %v62_v32 = vpop.permute.xlu1 %61  ;;  %v59_v33 = vpop.permute.xlu0 %58 }
  0x8a   :  { %vm98_vm6 = vcmp.eq.s32.totalorder %v28_v28, %v62_v32  ;;  %1048 = vmatmul.mubr.msk.bf16.vlgmr.msra.gmra.mrb[0].mxu0 %vm915_vm4, %v1253_v31  ;;  %vm97_vm7 = vcmp.eq.s32.totalorder %v28_v28, %v59_v33 }
  0x8b   :  { %vm917_vm8 = vmpackc.low %vm98_vm6, %vm97_vm7  ;;  %1096 = vmatpush3.bf16.msra.mxu0 %v1242_v45 }
  0x8c   :  { %1051 = vmatprep.mubr.msk.bf16.mxu0 %vm917_vm8, %v1253_v31  ;;  %1097 = vmatprep.subr.bf16.mxu0 %v1243_v46  ;;  %vm1255_vm8 = vmmov 0  }
  0x8d   :  { %v68_v34 = vpop.permute.xlu1 %67  ;;  %v65_v35 = vpop.permute.xlu0 %64 }
  0x8e   :  { %vm100_vm9 = vcmp.eq.s32.totalorder %v28_v28, %v68_v34  ;;  %vm99_vm10 = vcmp.eq.s32.totalorder %v28_v28, %v65_v35 }
  0x8f   :  { %vm919_vm11 = vmpackc.low %vm100_vm9, %vm99_vm10  ;;  %1098 = vmatpush3.bf16.msra.mxu0 %v1243_v46 }
  0x90   :  { %1099 = vmatprep.subr.bf16.mxu0 %v1244_v47 }
  0x91   :  { %v74_v36 = vpop.permute.xlu1 %73  ;;  %v71_v37 = vpop.permute.xlu0 %70 }
  0x92   :  { %vm102_vm12 = vcmp.eq.s32.totalorder %v28_v28, %v74_v36  ;;  %1052 = vmatmul.mubr.msk.bf16.gmra.mrb[4].mxu0 %vm919_vm11, %v1253_v31  ;;  %vm101_vm13 = vcmp.eq.s32.totalorder %v28_v28, %v71_v37 }
  0x93   :  { %vm921_vm14 = vmpackc.low %vm102_vm12, %vm101_vm13  ;;  %1100 = vmatpush3.bf16.msra.mxu0 %v1244_v47 }
  0x94   :  { %1055 = vmatprep.mubr.msk.bf16.mxu0 %vm921_vm14, %v1253_v31  ;;  %1101 = vmatprep.subr.bf16.mxu0 %v1245_v48 }
  0x95   :  { %v80_v38 = vpop.permute.xlu1 %79  ;;  %v77_v39 = vpop.permute.xlu0 %76 }
  0x96   :  { %vm104_vm15 = vcmp.eq.s32.totalorder %v28_v28, %v80_v38  ;;  %vm103_vm0 = vcmp.eq.s32.totalorder %v28_v28, %v77_v39 }
  0x97   :  { %vm923_vm1 = vmpackc.low %vm104_vm15, %vm103_vm0  ;;  %1102 = vmatpush3.bf16.msra.mxu0 %v1245_v48 }
  0x98   :  { %1103 = vmatprep.subr.bf16.mxu0 %v1246_v49 }
  0x99   :  { %v86_v40 = vpop.permute.xlu1 %85  ;;  %v83_v41 = vpop.permute.xlu0 %82 }
  0x9a   :  { %vm106_vm2 = vcmp.eq.s32.totalorder %v28_v28, %v86_v40  ;;  %1056 = vmatmul.mubr.msk.bf16.gmra.mrb[8].mxu0 %vm923_vm1, %v1253_v31  ;;  %vm105_vm3 = vcmp.eq.s32.totalorder %v28_v28, %v83_v41 }
  0x9b   :  { %vm925_vm4 = vmpackc.low %vm106_vm2, %vm105_vm3  ;;  %1104 = vmatpush3.bf16.msra.mxu0 %v1246_v49 }
  0x9c   :  { %1059 = vmatprep.mubr.msk.bf16.mxu0 %vm925_vm4, %v1253_v31  ;;  %1105 = vmatprep.subr.bf16.mxu0 %v1247_v50 }
  0x9d   :  { %v92_v42 = vpop.permute.xlu1 %91  ;;  %v89_v43 = vpop.permute.xlu0 %88 }
  0x9e   :  { %vm108_vm5 = vcmp.eq.s32.totalorder %v28_v28, %v92_v42  ;;  %vm107_vm6 = vcmp.eq.s32.totalorder %v28_v28, %v89_v43 }
  0x9f   :  { %vm927_vm7 = vmpackc.low %vm108_vm5, %vm107_vm6  ;;  %1106 = vmatpush3.bf16.msra.mxu0 %v1247_v50 }
  0xa0   :  { %1107 = vmatprep.subr.bf16.mxu0 %v1248_v18 }
  0xa2   :  { %1060 = vmatmul.mubr.msk.bf16.gmra.mrb[12].mxu0 %vm927_vm7, %v1253_v31 }
  0xa3   :  { %1108 = vmatpush3.bf16.msra.mxu0 %v1248_v18 }
  0xa4   :  { %1109 = vmatprep.subr.bf16.mxu0 %v1249_v19 }
  0xa7   :  { %1110 = vmatpush3.bf16.msra.mxu0 %v1249_v19 }
 0x15d   :  { %v1049_v51 = vpop.f32.mrb[0].mxu0 }
 0x15e   :  { %v247_v52 = vpop.f32.mrb[1].mxu0 }
 0x15f   :  { %v1050_v53 = vpop.f32.mrb[2].mxu0 }
 0x160   :  { %v327_v54 = vpack.c.bf16 %v1050_v53, %v1049_v51  ;;  %v250_v55 = vpop.f32.mrb[3].mxu0 }
 0x161   :  { %v326_v56 = vpack.c.bf16 %v250_v55, %v247_v52 }
 0x163   :  { %1063 = vmatprep.subr.bf16.mxu1 %v326_v56 }
 0x164   :  { %1064 = vmatpush3.bf16.msra.mxu1 %v326_v56 }
 0x165   :  { %v1053_v57 = vpop.f32.mrb[4].mxu0  ;;  %1065 = vmatprep.subr.bf16.mxu1 %v327_v54 }
 0x166   :  { %v263_v58 = vpop.f32.mrb[5].mxu0 }
 0x167   :  { %v1054_v59 = vpop.f32.mrb[6].mxu0 }
 0x168   :  { %v329_v60 = vpack.c.bf16 %v1054_v59, %v1053_v57  ;;  %v266_v61 = vpop.f32.mrb[7].mxu0  ;;  %1066 = vmatpush3.bf16.msra.mxu1 %v327_v54 }
 0x169   :  { %v328_v62 = vpack.c.bf16 %v266_v61, %v263_v58 }
 0x16b   :  { %1067 = vmatprep.subr.bf16.mxu1 %v328_v62 }
 0x16c   :  { %1068 = vmatpush3.bf16.msra.mxu1 %v328_v62 }
 0x16d   :  { %v1057_v63 = vpop.f32.mrb[8].mxu0  ;;  %1069 = vmatprep.subr.bf16.mxu1 %v329_v60 }
 0x16e   :  { %v279_v0 = vpop.f32.mrb[9].mxu0 }
 0x16f   :  { %v1058_v1 = vpop.f32.mrb[10].mxu0 }
 0x170   :  { %v331_v2 = vpack.c.bf16 %v1058_v1, %v1057_v63  ;;  %v282_v3 = vpop.f32.mrb[11].mxu0  ;;  %1070 = vmatpush3.bf16.msra.mxu1 %v329_v60 }
 0x171   :  { %v330_v4 = vpack.c.bf16 %v282_v3, %v279_v0 }
 0x173   :  { %1071 = vmatprep.subr.bf16.mxu1 %v330_v4 }
 0x174   :  { %1072 = vmatpush3.bf16.msra.mxu1 %v330_v4 }
 0x175   :  { %v1061_v5 = vpop.f32.mrb[12].mxu0  ;;  %1073 = vmatprep.subr.bf16.mxu1 %v331_v2 }
 0x176   :  { %v295_v6 = vpop.f32.mrb[13].mxu0 }
 0x177   :  { %v1062_v7 = vpop.f32.mrb[14].mxu0 }
 0x178   :  { %v333_v8 = vpack.c.bf16 %v1062_v7, %v1061_v5  ;;  %v298_v9 = vpop.f32.mrb[15].mxu0  ;;  %1074 = vmatpush3.bf16.msra.mxu1 %v331_v2 }
 0x179   :  { %v332_v10 = vpack.c.bf16 %v298_v9, %v295_v6 }
 0x17b   :  { %1075 = vmatprep.subr.bf16.mxu1 %v332_v10 }
 0x17c   :  { %1076 = vmatpush3.bf16.msra.mxu1 %v332_v10 }
 0x17d   :  { %1077 = vmatprep.subr.bf16.mxu1 %v333_v8 }
 0x180   :  { %1078 = vmatpush3.bf16.msra.mxu1 %v333_v8 }
 0x183   :  { %1080 = vmatmul.mubr.bf16.vlgmr.msra.gmra.mrb[0].mxu1 %v1398_v11 }
 0x184   :  { %1083 = vmatprep.mubr.bf16.mxu1 %v1403_v12 }
 0x18b   :  { %1084 = vmatmul.mubr.bf16.gmra.mrb[4].mxu1 %v1410_v13 }
 0x18c   :  { %1087 = vmatprep.mubr.bf16.mxu1 %v1415_v14 }
 0x193   :  { %1088 = vmatmul.mubr.bf16.gmra.mrb[8].mxu1 %v1422_v15 }
 0x194   :  { %1091 = vmatprep.mubr.bf16.mxu1 %v1427_v16 }
 0x19b   :  { %1092 = vmatmul.mubr.bf16.gmra.mrb[12].mxu1 %v1434_v17 }
 0x19c   :  { %1143 = vmatprep.mubr.bf16.mxu1 %v1374_v44 }
 0x256   :  { %v1081_v21 = vpop.f32.mrb[0].mxu1 }
 0x257   :  { %v432_v22 = vadd.f32 %v1081_v21, %v929_v20  ;;  %v423_v23 = vpop.f32.mrb[1].mxu1 }
 0x258   :  { %v424_v24 = vadd.f32 %v929_v20, %v423_v23  ;;  %v1082_v26 = vpop.f32.mrb[2].mxu1 }
 0x259   :  { %v435_v27 = vadd.f32 %v1082_v26, %v929_v20  ;;  %v426_v28 = vpop.f32.mrb[3].mxu1  ;;  %v488_v30 = vmax.f32 %v432_v22, 0.0 }
 0x25a   :  { %v427_v29 = vadd.f32 %v929_v20, %v426_v28  ;;  %v486_v32 = vmax.f32 %v424_v24, 0.0 }
 0x25b   :  { %v489_v31 = vmax.f32 %v435_v27, 0.0 }
 0x25c   :  { %v487_v33 = vmax.f32 %v427_v29, 0.0 }
 0x25d   :  { %v503_v34 = vpack.c.bf16 %v489_v31, %v488_v30 }
 0x25e   :  { %v502_v35 = vpack.c.bf16 %v487_v33, %v486_v32  ;;  %v1085_v36 = vpop.f32.mrb[4].mxu1 }
 0x25f   :  { %v448_v37 = vadd.f32 %v1085_v36, %v929_v20  ;;  %v439_v38 = vpop.f32.mrb[5].mxu1 }
 0x260   :  { %v440_v39 = vadd.f32 %v929_v20, %v439_v38  ;;  %v1086_v40 = vpop.f32.mrb[6].mxu1  ;;  %1111 = vmatprep.mubr.bf16.mxu0 %v502_v35 }
 0x261   :  { %v451_v41 = vadd.f32 %v1086_v40, %v929_v20  ;;  %v442_v42 = vpop.f32.mrb[7].mxu1  ;;  %1112 = vmatmul.mubr.bf16.vlgmr.msra.gmra.mrb[16].mxu0 %v503_v34  ;;  %v492_v44 = vmax.f32 %v448_v37, 0.0 }
 0x262   :  { %v443_v43 = vadd.f32 %v929_v20, %v442_v42  ;;  %v490_v46 = vmax.f32 %v440_v39, 0.0 }
 0x263   :  { %v493_v45 = vmax.f32 %v451_v41, 0.0 }
 0x264   :  { %v491_v47 = vmax.f32 %v443_v43, 0.0 }
 0x265   :  { %v505_v48 = vpack.c.bf16 %v493_v45, %v492_v44 }
 0x266   :  { %v504_v49 = vpack.c.bf16 %v491_v47, %v490_v46  ;;  %v1089_v50 = vpop.f32.mrb[8].mxu1  ;;  %v1254_v46 = vmov 0.0|0.0   ;;  %v1456_v47 = vshrl.u32 %v27_v25, 7  ;;  %v946_v25 = vld [vmem:[%s1490_s6] ss:$0 sm:$0xff] }
 0x267   :  { %v464_v51 = vadd.f32 %v1089_v50, %v929_v20  ;;  %v455_v52 = vpop.f32.mrb[9].mxu1  ;;  %1194 = vmatprep.subr.bf16.mxu0 %v1254_v46 }
 0x268   :  { %v456_v53 = vadd.f32 %v929_v20, %v455_v52  ;;  %v1090_v54 = vpop.f32.mrb[10].mxu1  ;;  %1115 = vmatprep.mubr.bf16.mxu0 %v504_v49 }
 0x269   :  { %v467_v55 = vadd.f32 %v1090_v54, %v929_v20  ;;  %v458_v56 = vpop.f32.mrb[11].mxu1  ;;  %1116 = vmatmul.mubr.bf16.gmra.mrb[20].mxu0 %v505_v48  ;;  %v496_v58 = vmax.f32 %v464_v51, 0.0 }
 0x26a   :  { %v459_v57 = vadd.f32 %v929_v20, %v458_v56  ;;  %v494_v60 = vmax.f32 %v456_v53, 0.0 }
 0x26b   :  { %v497_v59 = vmax.f32 %v467_v55, 0.0 }
 0x26c   :  { %v495_v61 = vmax.f32 %v459_v57, 0.0 }
 0x26d   :  { %v507_v62 = vpack.c.bf16 %v497_v59, %v496_v58 }
 0x26e   :  { %v506_v63 = vpack.c.bf16 %v495_v61, %v494_v60  ;;  %v1093_v0 = vpop.f32.mrb[12].mxu1 }
 0x26f   :  { %v480_v1 = vadd.f32 %v1093_v0, %v929_v20  ;;  %v471_v2 = vpop.f32.mrb[13].mxu1 }
 0x270   :  { %v472_v3 = vadd.f32 %v929_v20, %v471_v2  ;;  %v1094_v4 = vpop.f32.mrb[14].mxu1  ;;  %1119 = vmatprep.mubr.bf16.mxu0 %v506_v63 }
 0x271   :  { %v483_v5 = vadd.f32 %v1094_v4, %v929_v20  ;;  %v474_v6 = vpop.f32.mrb[15].mxu1  ;;  %1120 = vmatmul.mubr.bf16.gmra.mrb[24].mxu0 %v507_v62  ;;  %v500_v8 = vmax.f32 %v480_v1, 0.0 }
 0x272   :  { %v475_v7 = vadd.f32 %v929_v20, %v474_v6  ;;  %v498_v10 = vmax.f32 %v472_v3, 0.0 }
 0x273   :  { %v501_v9 = vmax.f32 %v483_v5, 0.0 }
 0x274   :  { %v499_v18 = vmax.f32 %v475_v7, 0.0 }
 0x275   :  { %v509_v19 = vpack.c.bf16 %v501_v9, %v500_v8 }
 0x276   :  { %v508_v21 = vpack.c.bf16 %v499_v18, %v498_v10 }
 0x278   :  { %1123 = vmatprep.mubr.bf16.mxu0 %v508_v21 }
 0x279   :  { %1124 = vmatmul.mubr.bf16.gmra.mrb[28].mxu0 %v509_v19 }
 0x334   :  { %v1113_v22 = vpop.f32.mrb[16].mxu0 }
 0x335   :  { %v608_v23 = vpop.f32.mrb[17].mxu0 }
 0x336   :  { %v1114_v24 = vpop.f32.mrb[18].mxu0 }
 0x337   :  { %v672_v26 = vpack.c.bf16 %v1114_v24, %v1113_v22  ;;  %v611_v27 = vpop.f32.mrb[19].mxu0 }
 0x338   :  { %v671_v28 = vpack.c.bf16 %v611_v27, %v608_v23 }
 0x33a   :  { %1127 = vmatprep.subr.bf16.mxu1 %v671_v28 }
 0x33b   :  { %1128 = vmatpush3.bf16.msra.mxu1 %v671_v28 }
 0x33c   :  { %v1117_v29 = vpop.f32.mrb[20].mxu0  ;;  %1129 = vmatprep.subr.bf16.mxu1 %v672_v26 }
 0x33d   :  { %v624_v30 = vpop.f32.mrb[21].mxu0 }
 0x33e   :  { %v1118_v20 = vpop.f32.mrb[22].mxu0 }
 0x33f   :  { %v674_v31 = vpack.c.bf16 %v1118_v20, %v1117_v29  ;;  %v627_v32 = vpop.f32.mrb[23].mxu0  ;;  %1130 = vmatpush3.bf16.msra.mxu1 %v672_v26 }
 0x340   :  { %v673_v33 = vpack.c.bf16 %v627_v32, %v624_v30 }
 0x342   :  { %1131 = vmatprep.subr.bf16.mxu1 %v673_v33 }
 0x343   :  { %1132 = vmatpush3.bf16.msra.mxu1 %v673_v33 }
 0x344   :  { %v1121_v34 = vpop.f32.mrb[24].mxu0  ;;  %1133 = vmatprep.subr.bf16.mxu1 %v674_v31 }
 0x345   :  { %v640_v35 = vpop.f32.mrb[25].mxu0 }
 0x346   :  { %v1122_v36 = vpop.f32.mrb[26].mxu0 }
 0x347   :  { %v676_v37 = vpack.c.bf16 %v1122_v36, %v1121_v34  ;;  %v643_v38 = vpop.f32.mrb[27].mxu0  ;;  %1134 = vmatpush3.bf16.msra.mxu1 %v674_v31 }
 0x348   :  { %v675_v39 = vpack.c.bf16 %v643_v38, %v640_v35 }
 0x34a   :  { %1135 = vmatprep.subr.bf16.mxu1 %v675_v39 }
 0x34b   :  { %1136 = vmatpush3.bf16.msra.mxu1 %v675_v39 }
 0x34c   :  { %v1125_v40 = vpop.f32.mrb[28].mxu0  ;;  %1137 = vmatprep.subr.bf16.mxu1 %v676_v37 }
 0x34d   :  { %v656_v41 = vpop.f32.mrb[29].mxu0 }
 0x34e   :  { %v1126_v42 = vpop.f32.mrb[30].mxu0 }
 0x34f   :  { %v678_v43 = vpack.c.bf16 %v1126_v42, %v1125_v40  ;;  %v659_v44 = vpop.f32.mrb[31].mxu0  ;;  %1138 = vmatpush3.bf16.msra.mxu1 %v676_v37 }
 0x350   :  { %v677_v45 = vpack.c.bf16 %v659_v44, %v656_v41  ;;  %v1257_v44 = vmov 1.0  }
 0x352   :  { %1139 = vmatprep.subr.bf16.mxu1 %v677_v45 }
 0x353   :  { %1140 = vmatpush3.bf16.msra.mxu1 %v677_v45 }
 0x354   :  { %1141 = vmatprep.subr.bf16.mxu1 %v678_v43 }
 0x357   :  { %1142 = vmatpush3.bf16.msra.mxu1 %v678_v43 }
 0x35a   :  { %1144 = vmatmul.mubr.bf16.vlgmr.msra.gmra.mrb[16].mxu1 %v1398_v11  ;;  %v1256_v11 = vmov 0.0  }
 0x35b   :  { %1147 = vmatprep.mubr.bf16.mxu1 %v1403_v12  ;;  %1191 = vmatprep.mubr.msk.f32.mxu0 %vm1255_vm8, %v1256_v11  ;;  %v1461_v12 = vld [vmem:[%s1489_s1] ss:$0 sm:$0xff] }
 0x35c   :  { %vm806_vm9 = vcmp.eq.s32.totalorder %v1456_v47, %v1461_v12 }
 0x362   :  { %1148 = vmatmul.mubr.bf16.gmra.mrb[20].mxu1 %v1410_v13  ;;  %v948_v13 = vsel %vm806_vm9, 1.0, %v1256_v11 }
 0x363   :  { %1151 = vmatprep.mubr.bf16.mxu1 %v1415_v14  ;;  %809 = vadd.xlane.f32.xlu0 %v948_v13 }
 0x36a   :  { %1152 = vmatmul.mubr.bf16.gmra.mrb[24].mxu1 %v1422_v15 }
 0x36b   :  { %1155 = vmatprep.mubr.bf16.mxu1 %v1427_v16 }
 0x372   :  { %1156 = vmatmul.mubr.bf16.gmra.mrb[28].mxu1 %v1434_v17 }
 0x3f0   :  { %v810_v45 = vpop.xlane.xlu0 %809 }
 0x3f1   :  { %v811_v11 = vmax.f32 %v810_v45, 1.0 }
 0x3f3   :  { %1250 = vrcp.f32 %v811_v11 }
 0x3fd   :  { %v1251_v13 = vpop.eup %1250 }
 0x42d   :  { %v1145_v14 = vpop.f32.mrb[16].mxu1 }
 0x42e   :  { %v729_v15 = vadd.f32 %v1145_v14, %v946_v25  ;;  %v720_v16 = vpop.f32.mrb[17].mxu1 }
 0x42f   :  { %v721_v17 = vadd.f32 %v946_v25, %v720_v16  ;;  %v1146_v48 = vpop.f32.mrb[18].mxu1 }
 0x430   :  { %v732_v49 = vadd.f32 %v1146_v48, %v946_v25  ;;  %v723_v50 = vpop.f32.mrb[19].mxu1  ;;  %v785_v52 = vmax.f32 %v729_v15, 0.0 }
 0x431   :  { %v724_v51 = vadd.f32 %v946_v25, %v723_v50  ;;  %v783_v54 = vmax.f32 %v721_v17, 0.0 }
 0x432   :  { %v786_v53 = vmax.f32 %v732_v49, 0.0 }
 0x433   :  { %v784_v55 = vmax.f32 %v724_v51, 0.0 }
 0x434   :  { %v1198_v56 = vpack.c.bf16 %v786_v53, %v785_v52 }
 0x435   :  { %v1195_v57 = vpack.c.bf16 %v784_v55, %v783_v54  ;;  %v1149_v58 = vpop.f32.mrb[20].mxu1 }
 0x436   :  { %v745_v59 = vadd.f32 %v1149_v58, %v946_v25  ;;  %v736_v60 = vpop.f32.mrb[21].mxu1 }
 0x437   :  { %v737_v61 = vadd.f32 %v946_v25, %v736_v60  ;;  %v1150_v62 = vpop.f32.mrb[22].mxu1  ;;  %1196 = vmatpush3.bf16.msra.mxu0 %v1195_v57 }
 0x438   :  { %v748_v63 = vadd.f32 %v1150_v62, %v946_v25  ;;  %v739_v0 = vpop.f32.mrb[23].mxu1  ;;  %1197 = vmatprep.subr.bf16.mxu0 %v1254_v46  ;;  %v789_v2 = vmax.f32 %v745_v59, 0.0 }
 0x439   :  { %v740_v1 = vadd.f32 %v946_v25, %v739_v0  ;;  %v787_v4 = vmax.f32 %v737_v61, 0.0 }
 0x43a   :  { %v790_v3 = vmax.f32 %v748_v63, 0.0 }
 0x43b   :  { %v788_v5 = vmax.f32 %v740_v1, 0.0  ;;  %1199 = vmatpush3.bf16.msra.mxu0 %v1198_v56 }
 0x43c   :  { %v1204_v6 = vpack.c.bf16 %v790_v3, %v789_v2  ;;  %1200 = vmatprep.subr.bf16.mxu0 %v1254_v46 }
 0x43d   :  { %v1201_v7 = vpack.c.bf16 %v788_v5, %v787_v4  ;;  %v1153_v8 = vpop.f32.mrb[24].mxu1 }
 0x43e   :  { %v761_v9 = vadd.f32 %v1153_v8, %v946_v25  ;;  %v752_v10 = vpop.f32.mrb[25].mxu1 }
 0x43f   :  { %v753_v18 = vadd.f32 %v946_v25, %v752_v10  ;;  %v1154_v19 = vpop.f32.mrb[26].mxu1  ;;  %1202 = vmatpush3.bf16.msra.mxu0 %v1201_v7 }
 0x440   :  { %v764_v21 = vadd.f32 %v1154_v19, %v946_v25  ;;  %v755_v22 = vpop.f32.mrb[27].mxu1  ;;  %1203 = vmatprep.subr.bf16.mxu0 %v1254_v46  ;;  %v793_v24 = vmax.f32 %v761_v9, 0.0 }
 0x441   :  { %v756_v23 = vadd.f32 %v946_v25, %v755_v22  ;;  %v791_v27 = vmax.f32 %v753_v18, 0.0 }
 0x442   :  { %v794_v26 = vmax.f32 %v764_v21, 0.0 }
 0x443   :  { %v792_v28 = vmax.f32 %v756_v23, 0.0  ;;  %1205 = vmatpush3.bf16.msra.mxu0 %v1204_v6 }
 0x444   :  { %v1210_v29 = vpack.c.bf16 %v794_v26, %v793_v24  ;;  %1206 = vmatprep.subr.bf16.mxu0 %v1254_v46 }
 0x445   :  { %v1207_v30 = vpack.c.bf16 %v792_v28, %v791_v27  ;;  %v1157_v20 = vpop.f32.mrb[28].mxu1 }
 0x446   :  { %v777_v31 = vadd.f32 %v1157_v20, %v946_v25  ;;  %v768_v32 = vpop.f32.mrb[29].mxu1 }
 0x447   :  { %v769_v33 = vadd.f32 %v946_v25, %v768_v32  ;;  %v1158_v34 = vpop.f32.mrb[30].mxu1  ;;  %1208 = vmatpush3.bf16.msra.mxu0 %v1207_v30 }
 0x448   :  { %v780_v35 = vadd.f32 %v1158_v34, %v946_v25  ;;  %v771_v36 = vpop.f32.mrb[31].mxu1  ;;  %1209 = vmatprep.subr.bf16.mxu0 %v1254_v46  ;;  %v797_v38 = vmax.f32 %v777_v31, 0.0 }
 0x449   :  { %v772_v37 = vadd.f32 %v946_v25, %v771_v36  ;;  %v795_v40 = vmax.f32 %v769_v33, 0.0 }
 0x44a   :  { %v798_v39 = vmax.f32 %v780_v35, 0.0 }
 0x44b   :  { %v796_v41 = vmax.f32 %v772_v37, 0.0  ;;  %1211 = vmatpush3.bf16.msra.mxu0 %v1210_v29 }
 0x44c   :  { %v1216_v42 = vpack.c.bf16 %v798_v39, %v797_v38  ;;  %1212 = vmatprep.subr.bf16.mxu0 %v1254_v46 }
 0x44d   :  { %v1213_v43 = vpack.c.bf16 %v796_v41, %v795_v40 }
 0x44f   :  { %1214 = vmatpush3.bf16.msra.mxu0 %v1213_v43 }
 0x450   :  { %1215 = vmatprep.subr.bf16.mxu0 %v1254_v46 }
 0x453   :  { %1217 = vmatpush3.bf16.msra.mxu0 %v1216_v42 }
 0x456   :  { %1192 = vmatmul.mubr.msk.f32.vlgmr.msra.gmra.mrb[32].mxu0 %vm806_vm9, %v1257_v44 }
 0x529   :  { %v878_v25 = vpop.f32.mrb[32].mxu0 }
 0x52a   :  { %v883_v14 = vmul.f32 %v1251_v13, %v878_v25  ;;  %v1193_v15 = vpop.f32.mrb[33].mxu0 }
 0x52c   :  { %884 = vst [vmem:[%s1491_s7] sm:$0xff] %v883_v14 }

</bundles_post_ra>
